<compile_context>
chip_gen: v7x
topology: tpu7x:2x2x1
jax: 0.10.0
libtpu: 0.0.40
codegen_flags: <defaults>
</compile_context>

<pallas_src>
import functools

import jax
import jax.numpy as jnp
from jax.experimental import pallas as pl
from jax.experimental.pallas import tpu as pltpu

_LANES = 128
_TM_MAX = 8192                      # rows per tile -> 8192*128*4B = 4 MiB (int32)
_VMEM_LIMIT_BYTES = 32 * 1024 * 1024


def _round_up(x: int, m: int) -> int:
    return ((x + m - 1) // m) * m


def _cdiv(a: int, b: int) -> int:
    return -(-a // b)


def _num_parallel_splits() -> int:
    """2-way outer split only where there are 2 TensorCores per chip (v7x)."""
    try:
        kind = jax.devices()[0].device_kind.lower()
    except Exception:
        return 1
    return 2 if ("v7" in kind or "tpu7" in kind) else 1


def _acc_sublanes(tm: int) -> int:
    """Widest accumulator (<=64 sublanes) that evenly divides the row tile."""
    for s in (64, 32, 16, 8):
        if tm % s == 0:
            return s
    return 8


def _accuracy_kernel(in_ref, tgt_ref, out_ref, *, tm, m_valid, nblk, ni,
                     acc_sub, mask_needed):
    """Accumulate per-(sublane, lane) equality counts into the resident
    (1, acc_sub, 128) int32 output block."""
    c = pl.program_id(0)              # parallel split (megacore axis)
    i = pl.program_id(1)              # sequential row-tile index within split

    @pl.when(i == 0)
    def _():
        out_ref[...] = jnp.zeros_like(out_ref)

    def _accumulate(eq_i32):
        # Fold the tile onto acc_sub sublane-groups: pure VPU adds with
        # acc_sub/8 independent vreg accumulators (ILP), no cross-lane reduce.
        out_ref[0] = out_ref[0] + eq_i32.reshape(-1, acc_sub, _LANES).sum(axis=0)

    def _fast_path():
        # Interior tile: every row is valid, no mask arithmetic.
        _accumulate((in_ref[...] == tgt_ref[...]).astype(jnp.int32))

    def _masked_path():
        # Boundary / duplicated tile: mask rows at or past the true row count.
        # (The index_map clamps the *physical* block; duplicated blocks have a
        # logical row0 >= m_valid and are fully masked away here.)
        row0 = (c * ni + i) * tm
        rows = jax.lax.broadcasted_iota(jnp.int32, (tm, _LANES), 0) + row0
        eq = (in_ref[...] == tgt_ref[...]) & (rows < m_valid)
        _accumulate(eq.astype(jnp.int32))

    if not mask_needed:
        _fast_path()                      # statically mask-free grid
    elif nblk == 1:
        _masked_path()                    # every tile is the boundary tile
    else:
        is_boundary = (c * ni + i) >= (nblk - 1)
        pl.when(jnp.logical_not(is_boundary))(_fast_path)
        pl.when(is_boundary)(_masked_path)


def _count_corrects(inp: jax.Array, tgt: jax.Array) -> jax.Array:
    """int32 count of positions where inp == tgt (Pallas streaming reduction)."""
    assert inp.shape == tgt.shape, "input/target must have the same shape"
    n = inp.size
    if n == 0:
        return jnp.int32(0)

    inp_flat = inp.reshape(-1)
    tgt_flat = tgt.reshape(-1)

    # Full rows of 128 lanes go through the kernel; the <128-element remainder
    # (if any) is counted in plain JAX (tiny).
    m = n // _LANES
    n_body = m * _LANES
    if n_body < n:
        tail = jnp.sum((inp_flat[n_body:] == tgt_flat[n_body:]).astype(jnp.int32))
    else:
        tail = jnp.int32(0)
    if m == 0:
        return tail

    if n_body == n:
        # Aligned case: free reshape of the contiguous buffer, no HBM copy.
        inp2d = inp_flat.reshape(m, _LANES)
        tgt2d = tgt_flat.reshape(m, _LANES)
    else:
        # TODO(synk): this prefix slice materializes a near-full-size HBM copy
        # of each input when n % 128 != 0 (~3x HBM traffic on a memory-bound
        # kernel). Eliminating it needs a flat 1-D BlockSpec with an in-kernel
        # relayout or a manual-DMA (pl.ANY) kernel.
        inp2d = inp_flat[:n_body].reshape(m, _LANES)
        tgt2d = tgt_flat[:n_body].reshape(m, _LANES)

    tm = min(_TM_MAX, _round_up(m, 8))       # sublane-aligned row tile
    acc_sub = _acc_sublanes(tm)              # accumulator sublane width
    nblk = _cdiv(m, tm)                      # total row tiles
    n_splits = max(1, min(_num_parallel_splits(), nblk))
    ni = _cdiv(nblk, n_splits)               # row tiles per parallel split
    # Mask is only needed if the last tile is partial or the grid has
    # duplicated (clamped) tiles.
    mask_needed = (m % tm != 0) or (n_splits * ni != nblk)

    def in_map(c, i):
        # Clamp so we never request a fully out-of-bounds block; the kernel's
        # logical-row mask zeroes any duplicated / padded rows.
        return (jnp.minimum(c * ni + i, nblk - 1), 0)

    kernel = functools.partial(
        _accuracy_kernel, tm=tm, m_valid=m, nblk=nblk, ni=ni,
        acc_sub=acc_sub, mask_needed=mask_needed)

    itemsize = inp2d.dtype.itemsize
    cost = pl.CostEstimate(
        flops=n_body,
        transcendentals=0,
        bytes_accessed=2 * n_body * itemsize + n_splits * acc_sub * _LANES * 4)

    partials = pl.pallas_call(
        kernel,
        out_shape=jax.ShapeDtypeStruct((n_splits, acc_sub, _LANES), jnp.int32),
        grid_spec=pltpu.PrefetchScalarGridSpec(
            num_scalar_prefetch=0,
            grid=(n_splits, ni),
            in_specs=[
                pl.BlockSpec((tm, _LANES), in_map),
                pl.BlockSpec((tm, _LANES), in_map),
            ],
            out_specs=pl.BlockSpec((1, acc_sub, _LANES), lambda c, i: (c, 0, 0)),
        ),
        compiler_params=pltpu.CompilerParams(
            dimension_semantics=("parallel", "arbitrary"),
            vmem_limit_bytes=_VMEM_LIMIT_BYTES),
        cost_estimate=cost,
    )(inp2d, tgt2d)

    return jnp.sum(partials, dtype=jnp.int32) + tail


class Accuracy:
    """Functional port of the PyTorch Accuracy module (buffers kept in JAX).

    Note: corrects/total accumulate in float32 across calls, mirroring the
    PyTorch module's .float() buffers (exactness lost past ~2^24 elements).
    """

    def __init__(self):
        self.corrects = jnp.zeros((1,), dtype=jnp.float32)
        self.total = jnp.zeros((1,), dtype=jnp.float32)

    def reset_buffers(self):
        self.corrects = jnp.zeros((1,), dtype=jnp.float32)
        self.total = jnp.zeros((1,), dtype=jnp.float32)

    def summarize(self):
        return self.corrects / self.total

    def __call__(self, inp: jax.Array, tgt: jax.Array) -> jax.Array:
        # Exact int32 count from the Pallas reduction; convert to float32 only
        # at the end to mirror the original module's .float() buffers.
        corrects = _count_corrects(inp, tgt).astype(jnp.float32)
        total = jnp.float32(tgt.size)
        batch_accuracy = corrects / total
        self.corrects = self.corrects + corrects
        self.total = self.total + total
        return batch_accuracy


if __name__ == "__main__":
    key = jax.random.PRNGKey(0)
    k1, k2, k3, k4 = jax.random.split(key, 4)

    # Small integer "prediction" vs "target" tensors, shape (2, 4, 16, 16).
    shape = (2, 4, 16, 16)
    inp = jax.random.randint(k1, shape, 0, 4, dtype=jnp.int32)
    tgt = jax.random.randint(k2, shape, 0, 4, dtype=jnp.int32)

    metric = Accuracy()
    acc = jax.block_until_ready(metric(inp, tgt))
    ref = jnp.mean((inp == tgt).astype(jnp.float32))
    assert jnp.allclose(acc, ref), (acc, ref)

    # Misaligned (n % 128 != 0) second batch exercises the masked / tail paths
    # and the cross-call buffer accumulation.
    shape2 = (5, 77)
    inp2 = jax.random.randint(k3, shape2, 0, 3, dtype=jnp.int32)
    tgt2 = jax.random.randint(k4, shape2, 0, 3, dtype=jnp.int32)
    acc2 = jax.block_until_ready(metric(inp2, tgt2))
    ref2 = jnp.mean((inp2 == tgt2).astype(jnp.float32))
    assert jnp.allclose(acc2, ref2), (acc2, ref2)

    total_corrects = (jnp.sum(inp == tgt) + jnp.sum(inp2 == tgt2)).astype(jnp.float32)
    ref_summary = total_corrects / jnp.float32(inp.size + inp2.size)
    assert jnp.allclose(metric.summarize()[0], ref_summary)

    print("KERNEL_OK")
</pallas_src>

<mosaic_0001>
module attributes {stable_mosaic.version = 11 : i64} {
  func.func @_accuracy_kernel(%arg0: i32, %arg1: i32, %arg2: memref<16x128xi32, #tpu.memory_space<vmem>>, %arg3: memref<16x128xi32, #tpu.memory_space<vmem>>, %arg4: memref<1x16x128xi32, #tpu.memory_space<vmem>>) attributes {dimension_semantics = [#tpu.dimension_semantics<parallel>, #tpu.dimension_semantics<arbitrary>], iteration_bounds = array<i64: 1, 1>, scalar_prefetch = 0 : i64, scratch_operands = 0 : i64, tpu.core_type = #tpu.core_type<tc>, window_params = [{transform_indices = @transform_0, window_bounds = array<i64: 16, 128>}, {transform_indices = @transform_1, window_bounds = array<i64: 16, 128>}, {transform_indices = @transform_2, window_bounds = array<i64: 1, 16, 128>}]} {
    %c0_i32 = arith.constant 0 : i32
    %0 = arith.cmpi eq, %arg1, %c0_i32 : i32
    %1 = arith.extui %0 : i1 to i32
    %c0_i32_0 = arith.constant 0 : i32
    %2 = arith.cmpi ne, %1, %c0_i32_0 : i32
    scf.if %2 {
      %c0_i32_10 = arith.constant 0 : i32
      %15 = vector.broadcast %c0_i32_10 : i32 to vector<1x16x128xi32>
      %c0_11 = arith.constant 0 : index
      %c0_12 = arith.constant 0 : index
      %c0_13 = arith.constant 0 : index
      %16 = vector.load %arg4[%c0_11, %c0_12, %c0_13] : memref<1x16x128xi32, #tpu.memory_space<vmem>>, vector<1x16x128xi32>
      tpu.vector_store %arg4[%c0_11, %c0_12, %c0_13], %15 {strides = array<i32>} : memref<1x16x128xi32, #tpu.memory_space<vmem>>, vector<1x16x128xi32>,
    } else {
    }
    %c0 = arith.constant 0 : index
    %c0_1 = arith.constant 0 : index
    %3 = vector.load %arg2[%c0, %c0_1] : memref<16x128xi32, #tpu.memory_space<vmem>>, vector<16x128xi32>
    %c0_2 = arith.constant 0 : index
    %c0_3 = arith.constant 0 : index
    %4 = vector.load %arg3[%c0_2, %c0_3] : memref<16x128xi32, #tpu.memory_space<vmem>>, vector<16x128xi32>
    %5 = arith.cmpi eq, %3, %4 : vector<16x128xi32>
    %6 = arith.extui %5 : vector<16x128xi1> to vector<16x128xi32>
    %c0_4 = arith.constant 0 : index
    %c0_5 = arith.constant 0 : index
    %c0_6 = arith.constant 0 : index
    %7 = vector.load %arg4[%c0_4, %c0_5, %c0_6] : memref<1x16x128xi32, #tpu.memory_space<vmem>>, vector<1x16x128xi32>
    %8 = vector.shape_cast %7 : vector<1x16x128xi32> to vector<16x128xi32>
    %9 = vector.shape_cast %6 : vector<16x128xi32> to vector<1x16x128xi32>
    %cst = arith.constant dense<0> : vector<16x128xi32>
    %10 = vector.multi_reduction <add>, %9, %cst [0] : vector<1x16x128xi32> to vector<16x128xi32>
    %11 = arith.addi %8, %10 : vector<16x128xi32>
    %c0_7 = arith.constant 0 : index
    %c0_8 = arith.constant 0 : index
    %c0_9 = arith.constant 0 : index
    %12 = vector.load %arg4[%c0_7, %c0_8, %c0_9] : memref<1x16x128xi32, #tpu.memory_space<vmem>>, vector<1x16x128xi32>
    %13 = vector.shape_cast %12 : vector<1x16x128xi32> to vector<16x128xi32>
    %14 = vector.shape_cast %11 : vector<16x128xi32> to vector<1x16x128xi32>
    tpu.vector_store %arg4[%c0_7, %c0_8, %c0_9], %14 {strides = array<i32>} : memref<1x16x128xi32, #tpu.memory_space<vmem>>, vector<1x16x128xi32>,
    return
  }
  func.func @transform_0(%arg0: i32, %arg1: i32) -> (i32, i32) {
    %c1_i32 = arith.constant 1 : i32
    %0 = arith.muli %arg0, %c1_i32 : i32
    %1 = arith.addi %0, %arg1 : i32
    %c0_i32 = arith.constant 0 : i32
    %2 = arith.minsi %1, %c0_i32 : i32
    %c0_i32_0 = arith.constant 0 : i32
    %c0_i32_1 = arith.constant 0 : i32
    return %2, %c0_i32_0 : i32, i32
  }
  func.func @transform_1(%arg0: i32, %arg1: i32) -> (i32, i32) {
    %c1_i32 = arith.constant 1 : i32
    %0 = arith.muli %arg0, %c1_i32 : i32
    %1 = arith.addi %0, %arg1 : i32
    %c0_i32 = arith.constant 0 : i32
    %2 = arith.minsi %1, %c0_i32 : i32
    %c0_i32_0 = arith.constant 0 : i32
    %c0_i32_1 = arith.constant 0 : i32
    return %2, %c0_i32_0 : i32, i32
  }
  func.func @transform_2(%arg0: i32, %arg1: i32) -> (i32, i32, i32) {
    %c0_i32 = arith.constant 0 : i32
    %c0_i32_0 = arith.constant 0 : i32
    %c0_i32_1 = arith.constant 0 : i32
    return %arg0, %c0_i32, %c0_i32_0 : i32, i32, i32
  }
}

</mosaic_0001>

<bundles_post_ra>
// kernel: tpu_custom_call.1
= control target key start
LH: loop header
LB: loop body
LE: loop exit
PB: predicated region body
PF: predicated region fallthrough
CT: control target
= control target key end

     0   :  { %7 = vsyncpa [#allocation3], 0  ;;  %s246_s0 = inlined_call_operand.hbm [shape: s32[16,128], index: 0, kind: input, shape index: {}]   ;;  %s247_s1 = inlined_call_operand.hbm [shape: s32[16,128], index: 1, kind: input, shape index: {}]   ;;  %s248_s2 = inlined_call_operand.hbm [shape: s32[1,16,128], index: 2, kind: output, shape index: {}]  }
   0x1   :  { %8 = vsyncpa [#allocation6], 0 }
   0x2   :  { %9 = vsyncpa [#allocation4], 0  ;;  %s180_s9 = smov [#allocation2]   ;;  %s108_s13 = scalar_lea.hbm %s246_s0, 256 }
   0x3   :  { %s21_s10 = sshll.u32 %s180_s9, 4  ;;  %p109_p0 = scmp.ne.s32.totalorder %s246_s0, %s108_s13  ;;  %s22_s10 = int_to_ptr.vmem [resolvable:$true] %s21_s10 }
   0x4   :  { %p112_p1 = scmp.lt.u32.totalorder %s108_s13, %s246_s0 }
   0x6   :  { %p114_p2 = pnand %p112_p1, %p109_p0 }
   0x8   :  { %117 = shalt.err (!%p114_p2)
}
   0x9   :  { %s118_s18 = scalar_lea.vmem %s22_s10, 256  ;;  %p123_p4 = scmp.lt.s32.totalorder %s22_s10, %s22_s10 }
   0xa   :  { %p119_p3 = scmp.ne.s32.totalorder %s22_s10, %s118_s18  ;;  %p124_p5 = scmp.lt.s32.totalorder %s118_s18, %s118_s18 }
   0xc   :  { %p125_p6 = por %p124_p5, %p123_p4 }
   0xe   :  { %p126_p7 = pnand %p125_p6, %p119_p3 }
  0x10   :  { %129 = shalt.err (!%p126_p7)
}
  0x11   :  { %s181_s19 = smov 128   ;;  %s182_s20 = smov 8  }
  0x12   :  { %27 = dma.hbm_to_vmem [thread:$0]  %s246_s0, 256, %s22_s10, [#allocation3], %s181_s19, %s181_s19, %s182_s20  }
  0x13   :  { %s183_s23 = smov [#allocation5]   ;;  %s130_s27 = scalar_lea.hbm %s247_s1, 256 }
  0x14   :  { %s39_s24 = sshll.u32 %s183_s23, 4  ;;  %p131_p8 = scmp.ne.s32.totalorder %s247_s1, %s130_s27  ;;  %s40_s24 = int_to_ptr.vmem [resolvable:$true] %s39_s24 }
  0x15   :  { %p134_p9 = scmp.lt.u32.totalorder %s130_s27, %s247_s1 }
  0x17   :  { %p136_p10 = pnand %p134_p9, %p131_p8 }
  0x19   :  { %139 = shalt.err (!%p136_p10)
}
  0x1a   :  { %s140_s4 = scalar_lea.vmem %s40_s24, 256  ;;  %p145_p12 = scmp.lt.s32.totalorder %s40_s24, %s40_s24 }
  0x1b   :  { %p141_p11 = scmp.ne.s32.totalorder %s40_s24, %s140_s4  ;;  %p146_p13 = scmp.lt.s32.totalorder %s140_s4, %s140_s4 }
  0x1d   :  { %p147_p0 = por %p146_p13, %p145_p12 }
  0x1f   :  { %p148_p1 = pnand %p147_p0, %p141_p11 }
  0x21   :  { %151 = shalt.err (!%p148_p1)
}
  0x22   :  { %45 = dma.hbm_to_vmem [thread:$0]  %s247_s1, 256, %s40_s24, [#allocation6], %s181_s19, %s181_s19, %s182_s20  }
  0x23   :  { %174 = dma.done.wait [#allocation3], 256  }
  0x24   :  { %175 = vsyncadd [#allocation3], 4294967040 }
  0x25   :  { %176 = dma.done.wait [#allocation6], 256  }
  0x26   :  { %177 = vsyncadd [#allocation6], 4294967040  ;;  %v66_v0 = vld [vmem:[#allocation2] sm:$0xff]  ;;  %v68_v1 = vld [vmem:[#allocation5] sm:$0xff]  ;;  %s184_s6 = smov [#allocation7]   ;;  %v185_v4 = vmov 0  }
  0x27   :  { %v67_v2 = vld [vmem:[#allocation2 + $0x8] sm:$0xff]  ;;  %vm70_vm0 = vcmp.eq.s32.totalorder %v66_v0, %v68_v1  ;;  %v69_v3 = vld [vmem:[#allocation5 + $0x8] sm:$0xff]  ;;  %s85_s7 = sshll.u32 %s184_s6, 4  ;;  %s86_s7 = int_to_ptr.vmem [resolvable:$true] %s85_s7 }
  0x28   :  { %v72_v5 = vsel %vm70_vm0, 1, %v185_v4  ;;  %vm71_vm1 = vcmp.eq.s32.totalorder %v67_v2, %v69_v3  ;;  %s152_s8 = scalar_lea.vmem %s86_s7, 256  ;;  %p157_p3 = scmp.lt.s32.totalorder %s86_s7, %s86_s7 }
  0x29   :  { %v73_v6 = vsel %vm71_vm1, 1, %v185_v4  ;;  %78 = vst [vmem:[#allocation7] sm:$0xff] %v72_v5  ;;  %p153_p2 = scmp.ne.s32.totalorder %s86_s7, %s152_s8  ;;  %p158_p4 = scmp.lt.s32.totalorder %s152_s8, %s152_s8 }
  0x2a   :  { %79 = vst [vmem:[#allocation7 + $0x8] sm:$0xff] %v73_v6 }
  0x2b   :  { %p159_p5 = por %p158_p4, %p157_p3 }
  0x2d   :  { %p160_p6 = pnand %p159_p5, %p153_p2 }
  0x2f   :  { %163 = shalt.err (!%p160_p6)
}
  0x30   :  { %s164_s10 = scalar_lea.hbm %s248_s2, 256 }
  0x31   :  { %p165_p7 = scmp.ne.s32.totalorder %s248_s2, %s164_s10  ;;  %p168_p8 = scmp.lt.u32.totalorder %s164_s10, %s248_s2 }
  0x33   :  { %p170_p9 = pnand %p168_p8, %p165_p7 }
  0x35   :  { %173 = shalt.err (!%p170_p9)
}
  0x36   :  { %91 = dma.vmem_to_hbm [thread:$0]  %s86_s7, 256, %s248_s2, [#allocation4], %s181_s19, %s181_s19, %s182_s20  }
  0x37   :  { %178 = dma.done.wait [#allocation4], 256  }
  0x38   :  { %179 = vsyncadd [#allocation4], 4294967040 }
  0x39   :  { %95 = vsyncpa [#allocation3], 1 }
  0x3a   :  { %96 = vsyncpa [#allocation6], 1 }
  0x3b   :  { %97 = vsyncpa [#allocation4], 1 }

</bundles_post_ra>
